<compile_context>
chip_gen: v6e
topology: v6e:2x2x1
jax: 0.10.0
libtpu: 0.0.40
codegen_flags: <defaults>
</compile_context>

<pallas_src>
import jax
import jax.numpy as jnp
from jax.experimental import pallas as pl
from jax.experimental.pallas import tpu as pltpu


def _round_up(x: int, m: int) -> int:
    return ((x + m - 1) // m) * m


def mlp_kernel(xT_ref, w1_ref, b1_ref, w2_ref, b2_ref, oT_ref):
    # Feature-major: all operands are (features, batch).
    # fc1: (hidden, t_dim) @ (t_dim, tile_b) -> f32 accumulator (hidden, tile_b).
    xT = xT_ref[...]
    h = jnp.dot(w1_ref[...], xT.astype(w1_ref.dtype),
                preferred_element_type=jnp.float32)
    # Bias + LeakyReLU(0.2) on the f32 accumulator (v5e has no bf16 VPU path).
    h = h + b1_ref[...]                      # (hidden, 1) lane-broadcast
    h = jnp.maximum(h, 0.2 * h)              # LeakyReLU(0.2), single VALU op
    # fc2: (nclass, hidden) @ (hidden, tile_b) -> (nclass, tile_b).
    # Explicit cast of the activation to the stored weight dtype.
    out = jnp.dot(w2_ref[...], h.astype(w2_ref.dtype),
                  preferred_element_type=jnp.float32)
    out = out + b2_ref[...]                  # (nclass, 1) lane-broadcast
    oT_ref[...] = out.astype(oT_ref.dtype)


def prepare_params(w1, b1, w2, b2, compute_dtype=jnp.bfloat16):
    """One-time parameter prep (call at load time, NOT per forward).

    w1: (hidden, t_dim)  b1: (hidden,)  w2: (nclass, hidden)  b2: (nclass,)
    Feature-major kernel layout == PyTorch Linear layout, so weights need no
    transpose; biases become (n, 1) f32 columns; weights stored in compute_dtype
    (default bf16 for native MXU rate + half the weight DMA on all generations).
    """
    hidden, t_dim = w1.shape
    nclass = w2.shape[0]

    params = dict(
        w1=w1.astype(compute_dtype),                      # (hidden, t_dim)
        b1=b1.reshape(hidden, 1).astype(jnp.float32),     # (hidden, 1)
        w2=w2.astype(compute_dtype),                      # (nclass, hidden)
        b2=b2.reshape(nclass, 1).astype(jnp.float32),     # (nclass, 1)
        t_dim=t_dim, hidden=hidden, nclass=nclass,
    )
    return params


def cls_forward(x, params, *, max_tile_b=2048, megacore_min_b=2048):
    """x: (B, t_dim) float32. Returns (B, nclass) in x.dtype."""
    B, t_dim = x.shape
    assert t_dim == params["t_dim"]
    hidden = params["hidden"]
    nclass = params["nclass"]
    w1, b1, w2, b2 = params["w1"], params["b1"], params["w2"], params["b2"]

    # Batch tiling: few, large tiles amortize the ~0.35 us/grid-step overhead.
    # With >1 tile the lane (batch) axis of every block must be a multiple of 128;
    # with a single tile the block spans the full (unpadded) batch extent.
    # For large B force an even tile count so the "parallel" axis shards across
    # both v7x TensorCores (irrelevant on v5e/v6e: 1 TC).
    num_tiles = pl.cdiv(B, max_tile_b)
    if B >= megacore_min_b and num_tiles % 2 == 1:
        num_tiles += 1
    tile_b = B if num_tiles == 1 else _round_up(pl.cdiv(B, num_tiles), 128)
    B_pad = num_tiles * tile_b

    # Layout plumbing (wrapper-side, not compute): present a feature-major slab so
    # in-kernel loads/stores are lane-dense along batch.
    xT = x.T                                               # (t_dim, B)
    if B_pad != B:
        xT = jnp.pad(xT, ((0, 0), (0, B_pad - B)))

    x_itemsize = jnp.dtype(x.dtype).itemsize
    w_itemsize = jnp.dtype(w1.dtype).itemsize
    cost = pl.CostEstimate(
        flops=2 * B_pad * t_dim * hidden + 2 * B_pad * hidden * nclass,
        transcendentals=0,
        bytes_accessed=(B_pad * t_dim * x_itemsize                      # x^T
                        + (hidden * t_dim + nclass * hidden) * w_itemsize  # weights
                        + (hidden + nclass) * 4                          # biases
                        + B_pad * nclass * x_itemsize),                  # out^T
    )

    outT = pl.pallas_call(
        mlp_kernel,
        out_shape=jax.ShapeDtypeStruct((nclass, B_pad), x.dtype),
        grid=(num_tiles,),
        in_specs=[
            pl.BlockSpec((t_dim, tile_b), lambda i: (0, i)),    # x^T: streamed per tile
            pl.BlockSpec((hidden, t_dim), lambda i: (0, 0)),    # w1: VMEM-resident
            pl.BlockSpec((hidden, 1), lambda i: (0, 0)),        # b1: VMEM-resident
            pl.BlockSpec((nclass, hidden), lambda i: (0, 0)),   # w2: VMEM-resident
            pl.BlockSpec((nclass, 1), lambda i: (0, 0)),        # b2: VMEM-resident
        ],
        out_specs=pl.BlockSpec((nclass, tile_b), lambda i: (0, i)),  # lane-dense stores
        compiler_params=pltpu.CompilerParams(
            dimension_semantics=("parallel",)),
        cost_estimate=cost,
    )(xT, w1, b1, w2, b2)

    return outT[:, :B].T                                   # (B, nclass)


def reference_forward(x, w1, b1, w2, b2):
    h = x @ w1.T + b1
    h = jnp.where(h > 0, h, 0.2 * h)
    return h @ w2.T + b2


if __name__ == "__main__":
    # Small shapes consistent with the module: opt.t_dim=32, hidden=512 (fixed
    # by the module), nclass=16, batch=8.
    B, T_DIM, HIDDEN, NCLASS = 8, 32, 512, 16

    key = jax.random.PRNGKey(0)
    k_x, k_w1, k_b1, k_w2, k_b2 = jax.random.split(key, 5)

    x = jax.random.normal(k_x, (B, T_DIM), dtype=jnp.float32)
    # Deterministic parameter init (PyTorch nn.Linear-like uniform scale).
    bound1 = 1.0 / (T_DIM ** 0.5)
    bound2 = 1.0 / (HIDDEN ** 0.5)
    w1 = jax.random.uniform(k_w1, (HIDDEN, T_DIM), jnp.float32, -bound1, bound1)
    b1 = jax.random.uniform(k_b1, (HIDDEN,), jnp.float32, -bound1, bound1)
    w2 = jax.random.uniform(k_w2, (NCLASS, HIDDEN), jnp.float32, -bound2, bound2)
    b2 = jax.random.uniform(k_b2, (NCLASS,), jnp.float32, -bound2, bound2)

    ref = reference_forward(x, w1, b1, w2, b2)

    # Fast path: bf16 weight storage (default). f32 accumulation keeps the error
    # at the bf16-rounding level, so check with loosened tolerances.
    params_bf16 = prepare_params(w1, b1, w2, b2)           # compute_dtype=bf16
    out = cls_forward(x, params_bf16)
    jax.block_until_ready(out)
    assert out.shape == (B, NCLASS)
    assert jnp.allclose(out, ref, atol=5e-2, rtol=5e-2)

    # Exact-tolerance sanity check of the same kernel with f32 weight storage.
    params_f32 = prepare_params(w1, b1, w2, b2, compute_dtype=jnp.float32)
    out_f32 = cls_forward(x, params_f32)
    jax.block_until_ready(out_f32)
    assert out_f32.shape == (B, NCLASS)
    assert jnp.allclose(out_f32, ref, atol=1e-4, rtol=1e-4)

    print("KERNEL_OK")
</pallas_src>

<mosaic_0001>
module attributes {stable_mosaic.version = 11 : i64} {
  func.func @mlp_kernel(%arg0: i32, %arg1: memref<32x8xf32, #tpu.memory_space<vmem>>, %arg2: memref<512x32xbf16, #tpu.memory_space<vmem>>, %arg3: memref<512x1xf32, #tpu.memory_space<vmem>>, %arg4: memref<16x512xbf16, #tpu.memory_space<vmem>>, %arg5: memref<16x1xf32, #tpu.memory_space<vmem>>, %arg6: memref<16x8xf32, #tpu.memory_space<vmem>>) attributes {dimension_semantics = [#tpu.dimension_semantics<parallel>], iteration_bounds = array<i64: 1>, scalar_prefetch = 0 : i64, scratch_operands = 0 : i64, tpu.core_type = #tpu.core_type<tc>, window_params = [{transform_indices = @transform_0, window_bounds = array<i64: 32, 8>}, {pipeline_mode = #tpu.pipeline_mode<synchronous>, transform_indices = @transform_1, window_bounds = array<i64: 512, 32>}, {pipeline_mode = #tpu.pipeline_mode<synchronous>, transform_indices = @transform_2, window_bounds = array<i64: 512, 1>}, {pipeline_mode = #tpu.pipeline_mode<synchronous>, transform_indices = @transform_3, window_bounds = array<i64: 16, 512>}, {pipeline_mode = #tpu.pipeline_mode<synchronous>, transform_indices = @transform_4, window_bounds = array<i64: 16, 1>}, {transform_indices = @transform_5, window_bounds = array<i64: 16, 8>}]} {
    %c0 = arith.constant 0 : index
    %c0_0 = arith.constant 0 : index
    %0 = vector.load %arg1[%c0, %c0_0] : memref<32x8xf32, #tpu.memory_space<vmem>>, vector<32x8xf32>
    %c0_1 = arith.constant 0 : index
    %c0_2 = arith.constant 0 : index
    %1 = vector.load %arg2[%c0_1, %c0_2] : memref<512x32xbf16, #tpu.memory_space<vmem>>, vector<512x32xbf16>
    %2 = arith.truncf %0 : vector<32x8xf32> to vector<32x8xbf16>
    %cst = arith.constant dense<0.000000e+00> : vector<512x8xf32>
    %3 = tpu.matmul %1, %2, %cst {dimension_numbers = #tpu.dot_dimension_numbers<[1], [0], [0], [1], [0, 0, 1, 1], [], []>} : vector<512x32xbf16>, vector<32x8xbf16>, vector<512x8xf32> -> vector<512x8xf32>
    %c0_3 = arith.constant 0 : index
    %c0_4 = arith.constant 0 : index
    %4 = vector.load %arg3[%c0_3, %c0_4] : memref<512x1xf32, #tpu.memory_space<vmem>>, vector<512x1xf32>
    %5 = vector.broadcast %4 : vector<512x1xf32> to vector<512x8xf32>
    %6 = arith.addf %3, %5 : vector<512x8xf32>
    %cst_5 = arith.constant 2.000000e-01 : f32
    %7 = vector.broadcast %cst_5 : f32 to vector<512x8xf32>
    %8 = arith.mulf %7, %6 : vector<512x8xf32>
    %9 = arith.maximumf %6, %8 : vector<512x8xf32>
    %c0_6 = arith.constant 0 : index
    %c0_7 = arith.constant 0 : index
    %10 = vector.load %arg4[%c0_6, %c0_7] : memref<16x512xbf16, #tpu.memory_space<vmem>>, vector<16x512xbf16>
    %11 = arith.truncf %9 : vector<512x8xf32> to vector<512x8xbf16>
    %cst_8 = arith.constant dense<0.000000e+00> : vector<16x8xf32>
    %12 = tpu.matmul %10, %11, %cst_8 {dimension_numbers = #tpu.dot_dimension_numbers<[1], [0], [0], [1], [0, 0, 1, 1], [], []>} : vector<16x512xbf16>, vector<512x8xbf16>, vector<16x8xf32> -> vector<16x8xf32>
    %c0_9 = arith.constant 0 : index
    %c0_10 = arith.constant 0 : index
    %13 = vector.load %arg5[%c0_9, %c0_10] : memref<16x1xf32, #tpu.memory_space<vmem>>, vector<16x1xf32>
    %14 = vector.broadcast %13 : vector<16x1xf32> to vector<16x8xf32>
    %15 = arith.addf %12, %14 : vector<16x8xf32>
    %c0_11 = arith.constant 0 : index
    %c0_12 = arith.constant 0 : index
    %16 = vector.load %arg6[%c0_11, %c0_12] : memref<16x8xf32, #tpu.memory_space<vmem>>, vector<16x8xf32>
    tpu.vector_store %arg6[%c0_11, %c0_12], %15 {strides = array<i32>} : memref<16x8xf32, #tpu.memory_space<vmem>>, vector<16x8xf32>,
    return
  }
  func.func @transform_0(%arg0: i32) -> (i32, i32) {
    %c0_i32 = arith.constant 0 : i32
    %c0_i32_0 = arith.constant 0 : i32
    return %c0_i32, %arg0 : i32, i32
  }
  func.func @transform_1(%arg0: i32) -> (i32, i32) {
    %c0_i32 = arith.constant 0 : i32
    %c0_i32_0 = arith.constant 0 : i32
    %c0_i32_1 = arith.constant 0 : i32
    return %c0_i32, %c0_i32_0 : i32, i32
  }
  func.func @transform_2(%arg0: i32) -> (i32, i32) {
    %c0_i32 = arith.constant 0 : i32
    %c0_i32_0 = arith.constant 0 : i32
    %c0_i32_1 = arith.constant 0 : i32
    return %c0_i32, %c0_i32_0 : i32, i32
  }
  func.func @transform_3(%arg0: i32) -> (i32, i32) {
    %c0_i32 = arith.constant 0 : i32
    %c0_i32_0 = arith.constant 0 : i32
    %c0_i32_1 = arith.constant 0 : i32
    return %c0_i32, %c0_i32_0 : i32, i32
  }
  func.func @transform_4(%arg0: i32) -> (i32, i32) {
    %c0_i32 = arith.constant 0 : i32
    %c0_i32_0 = arith.constant 0 : i32
    %c0_i32_1 = arith.constant 0 : i32
    return %c0_i32, %c0_i32_0 : i32, i32
  }
  func.func @transform_5(%arg0: i32) -> (i32, i32) {
    %c0_i32 = arith.constant 0 : i32
    %c0_i32_0 = arith.constant 0 : i32
    return %c0_i32, %arg0 : i32, i32
  }
}

</mosaic_0001>

<bundles_post_ra>
// kernel: tpu_custom_call.1
= control target key start
LH: loop header
LB: loop body
LE: loop exit
PB: predicated region body
PF: predicated region fallthrough
CT: control target
= control target key end

     0   :  { %v1565_v0 = vmov 0   ;;  %vm635_vm0 = vcmask 261120   ;;  %vm1299_vm1 = vcmask 64512   ;;  %s2225_s2 = inlined_call_operand.vmem [shape: f32[512,1], index: 2, kind: input, shape index: {}]   ;;  %s2226_s0 = inlined_call_operand.vmem [shape: f32[32,8], index: 0, kind: input, shape index: {}]   ;;  %s2227_s1 = inlined_call_operand.vmem [shape: bf16[512,32], index: 1, kind: input, shape index: {}]   ;;  %s2228_s4 = inlined_call_operand.vmem [shape: f32[16,1], index: 4, kind: input, shape index: {}]   ;;  %s2229_s3 = inlined_call_operand.vmem [shape: bf16[16,512], index: 3, kind: input, shape index: {}]   ;;  %s2230_s5 = inlined_call_operand.vmem [shape: f32[16,8], index: 5, kind: output, shape index: {}]  }
   0x1   :  { %1526 = vset.pattern.permute.xlu1 %v1565_v0  ;;  %1525 = vset.pattern.permute.xlu0 %v1565_v0  ;;  %v121_v1 = vld [vmem:[%s2225_s2 + $0xf0] sm:$0xff]  ;;  %v24_v4 = vld [vmem:[%s2226_s0 + $0x18] sm:$0xff]  ;;  %v21_v7 = vld [vmem:[%s2226_s0] sm:$0xff] }
   0x2   :  { %v105_v2 = vld [vmem:[%s2225_s2 + $0x70] sm:$0xff]  ;;  %307 = vperm.xlu0 %1525, %v121_v1   ;;  %v122_v6 = vld [vmem:[%s2225_s2 + $0xf8] sm:$0xff]  ;;  %v22_v8 = vld [vmem:[%s2226_s0 + $0x8] sm:$0xff] }
   0x3   :  { %v23_v3 = vld [vmem:[%s2226_s0 + $0x10] sm:$0xff]  ;;  %227 = vperm.xlu1 %1526, %v105_v2   ;;  %v106_v9 = vld [vmem:[%s2225_s2 + $0x78] sm:$0xff]  ;;  %v89_v10 = vpack.c.bf16 %v22_v8, %v21_v7  ;;  %v1527_v11 = vld [vmem:[%s2227_s1] sm:$0xff]  }
   0x4   :  { %v90_v5 = vpack.c.bf16 %v24_v4, %v23_v3  ;;  %v1528_v12 = vld [vmem:[%s2227_s1 + $0xb0] sm:$0xff]   ;;  %v119_v13 = vld [vmem:[%s2225_s2 + $0xe0] sm:$0xff]  ;;  %v120_v14 = vld [vmem:[%s2225_s2 + $0xe8] sm:$0xff]  ;;  %1456 = vmatprep.mubr.msk.bf16.mxu0 %vm635_vm0, %v1527_v11 }
   0x5   :  { %1500 = vmatprep.mubr.msk.bf16.mxu1 %vm635_vm0, %v1528_v12  ;;  %v1529_v15 = vld [vmem:[%s2227_s1 + $0x8] sm:$0xff]   ;;  %v1530_v16 = vld [vmem:[%s2227_s1 + $0xb8] sm:$0xff]   ;;  %v1531_v18 = vld [vmem:[%s2227_s1 + $0x10] sm:$0xff]  }
   0x6   :  { %1452 = vmatprep.subr.bf16.mxu0 %v90_v5  ;;  %1520 = vmatprep.subr.bf16.mxu1 %v90_v5  ;;  %v104_v17 = vld [vmem:[%s2225_s2 + $0x68] sm:$0xff]  ;;  %v1532_v19 = vld [vmem:[%s2227_s1 + $0xc0] sm:$0xff]   ;;  %v118_v21 = vld [vmem:[%s2225_s2 + $0xd8] sm:$0xff] }
   0x7   :  { %1453 = vmatpush3.bf16.msra.mxu0 %v90_v5  ;;  %1522 = vmatpush3.bf16.msra.mxu1 %v90_v5  ;;  %v103_v20 = vld [vmem:[%s2225_s2 + $0x60] sm:$0xff]  ;;  %v117_v22 = vld [vmem:[%s2225_s2 + $0xd0] sm:$0xff]  ;;  %v1533_v23 = vld [vmem:[%s2227_s1 + $0x18] sm:$0xff]  }
   0x8   :  { %312 = vperm.xlu0 %1525, %v122_v6   ;;  %232 = vperm.xlu1 %1526, %v106_v9   ;;  %v1534_v24 = vld [vmem:[%s2227_s1 + $0xc8] sm:$0xff]   ;;  %v1535_v25 = vld [vmem:[%s2227_s1 + $0x20] sm:$0xff]   ;;  %v1536_v26 = vld [vmem:[%s2227_s1 + $0xd0] sm:$0xff]  }
   0x9   :  { %1454 = vmatprep.subr.bf16.mxu0 %v89_v10  ;;  %1521 = vmatprep.subr.bf16.mxu1 %v89_v10  ;;  %v102_v27 = vld [vmem:[%s2225_s2 + $0x58] sm:$0xff]  ;;  %v101_v28 = vld [vmem:[%s2225_s2 + $0x50] sm:$0xff]  ;;  %v116_v29 = vld [vmem:[%s2225_s2 + $0xc8] sm:$0xff] }
   0xa   :  { %v115_v30 = vld [vmem:[%s2225_s2 + $0xc0] sm:$0xff]  ;;  %v1537_v31 = vld [vmem:[%s2227_s1 + $0x28] sm:$0xff]   ;;  %v1538_v32 = vld [vmem:[%s2227_s1 + $0xd8] sm:$0xff]  }
   0xb   :  { %1455 = vmatpush3.bf16.msra.mxu0 %v89_v10  ;;  %1523 = vmatpush3.bf16.msra.mxu1 %v89_v10  ;;  %v1539_v33 = vld [vmem:[%s2227_s1 + $0x30] sm:$0xff]   ;;  %v1540_v34 = vld [vmem:[%s2227_s1 + $0xe0] sm:$0xff]   ;;  %v100_v35 = vld [vmem:[%s2225_s2 + $0x48] sm:$0xff] }
   0xc   :  { %297 = vperm.xlu0 %1525, %v119_v13   ;;  %302 = vperm.xlu1 %1526, %v120_v14   ;;  %v99_v36 = vld [vmem:[%s2225_s2 + $0x40] sm:$0xff]  ;;  %v114_v37 = vld [vmem:[%s2225_s2 + $0xb8] sm:$0xff]  ;;  %v113_v38 = vld [vmem:[%s2225_s2 + $0xb0] sm:$0xff] }
   0xd   :  { %v1541_v39 = vld [vmem:[%s2227_s1 + $0x38] sm:$0xff]   ;;  %v1542_v40 = vld [vmem:[%s2227_s1 + $0xe8] sm:$0xff]   ;;  %v1543_v41 = vld [vmem:[%s2227_s1 + $0x40] sm:$0xff]  }
   0xe   :  { %1457 = vmatmul.mubr.msk.bf16.vlgmr.msra.gmra.mxu0 %vm635_vm0, %v1529_v15  ;;  %1501 = vmatmul.mubr.msk.bf16.vlgmr.msra.gmra.mxu1 %vm635_vm0, %v1530_v16  ;;  %v1544_v42 = vld [vmem:[%s2227_s1 + $0xf0] sm:$0xff]   ;;  %v98_v43 = vld [vmem:[%s2225_s2 + $0x38] sm:$0xff]  ;;  %v112_v45 = vld [vmem:[%s2225_s2 + $0xa8] sm:$0xff] }
   0xf   :  { %1460 = vmatprep.mubr.msk.bf16.mxu0 %vm635_vm0, %v1531_v18  ;;  %1504 = vmatprep.mubr.msk.bf16.mxu1 %vm635_vm0, %v1532_v19  ;;  %v97_v44 = vld [vmem:[%s2225_s2 + $0x30] sm:$0xff]  ;;  %v111_v46 = vld [vmem:[%s2225_s2 + $0xa0] sm:$0xff]  ;;  %v1545_v47 = vld [vmem:[%s2227_s1 + $0x48] sm:$0xff]  }
  0x10   :  { %222 = vperm.xlu1 %1526, %v104_v17   ;;  %217 = vperm.xlu0 %1525, %v103_v20   ;;  %v1546_v48 = vld [vmem:[%s2227_s1 + $0xf8] sm:$0xff]   ;;  %v1547_v49 = vld [vmem:[%s2227_s1 + $0x50] sm:$0xff]   ;;  %v96_v50 = vld [vmem:[%s2225_s2 + $0x28] sm:$0xff] }
  0x11   :  { %v95_v51 = vld [vmem:[%s2225_s2 + $0x20] sm:$0xff]  ;;  %v110_v52 = vld [vmem:[%s2225_s2 + $0x98] sm:$0xff]  ;;  %v109_v53 = vld [vmem:[%s2225_s2 + $0x90] sm:$0xff] }
  0x12   :  { %v1548_v54 = vld [vmem:[%s2227_s1 + $0x58] sm:$0xff]   ;;  %v1549_v55 = vld [vmem:[%s2227_s1 + $0x60] sm:$0xff]   ;;  %v93_v57 = vld [vmem:[%s2225_s2 + $0x10] sm:$0xff] }
  0x13   :  { %v94_v56 = vld [vmem:[%s2225_s2 + $0x18] sm:$0xff]  ;;  %v108_v58 = vld [vmem:[%s2225_s2 + $0x88] sm:$0xff]  ;;  %v107_v59 = vld [vmem:[%s2225_s2 + $0x80] sm:$0xff] }
  0x14   :  { %292 = vperm.xlu1 %1526, %v118_v21   ;;  %287 = vperm.xlu0 %1525, %v117_v22   ;;  %v1550_v60 = vld [vmem:[%s2227_s1 + $0x68] sm:$0xff]   ;;  %v1551_v61 = vld [vmem:[%s2227_s1 + $0x70] sm:$0xff]   ;;  %v91_v63 = vld [vmem:[%s2225_s2] sm:$0xff] }
  0x15   :  { %v92_v62 = vld [vmem:[%s2225_s2 + $0x8] sm:$0xff]  ;;  %v154_v0 = vld [vmem:[%s2225_s2 + $0x1f8] sm:$0xff]  ;;  %v153_v1 = vld [vmem:[%s2225_s2 + $0x1f0] sm:$0xff] }
  0x16   :  { %1461 = vmatmul.mubr.msk.bf16.gmra.mxu0 %vm635_vm0, %v1533_v23  ;;  %1505 = vmatmul.mubr.msk.bf16.gmra.mxu1 %vm635_vm0, %v1534_v24  ;;  %v1552_v2 = vld [vmem:[%s2227_s1 + $0x78] sm:$0xff]   ;;  %v1553_v3 = vld [vmem:[%s2227_s1 + $0x80] sm:$0xff]   ;;  %v137_v5 = vld [vmem:[%s2225_s2 + $0x170] sm:$0xff] }
  0x17   :  { %1464 = vmatprep.mubr.msk.bf16.mxu0 %vm635_vm0, %v1535_v25  ;;  %1508 = vmatprep.mubr.msk.bf16.mxu1 %vm635_vm0, %v1536_v26  ;;  %v138_v4 = vld [vmem:[%s2225_s2 + $0x178] sm:$0xff]  ;;  %v152_v6 = vld [vmem:[%s2225_s2 + $0x1e8] sm:$0xff]  ;;  %v151_v7 = vld [vmem:[%s2225_s2 + $0x1e0] sm:$0xff] }
  0x18   :  { %212 = vperm.xlu1 %1526, %v102_v27   ;;  %207 = vperm.xlu0 %1525, %v101_v28   ;;  %v1554_v8 = vld [vmem:[%s2227_s1 + $0x88] sm:$0xff]   ;;  %v1555_v9 = vld [vmem:[%s2227_s1 + $0x90] sm:$0xff]   ;;  %v135_v11 = vld [vmem:[%s2225_s2 + $0x160] sm:$0xff] }
  0x19   :  { %v136_v10 = vld [vmem:[%s2225_s2 + $0x168] sm:$0xff]  ;;  %v150_v12 = vld [vmem:[%s2225_s2 + $0x1d8] sm:$0xff]  ;;  %v149_v13 = vld [vmem:[%s2225_s2 + $0x1d0] sm:$0xff] }
  0x1a   :  { %v1556_v14 = vld [vmem:[%s2227_s1 + $0x98] sm:$0xff]   ;;  %v1557_v15 = vld [vmem:[%s2227_s1 + $0xa0] sm:$0xff]   ;;  %v133_v17 = vld [vmem:[%s2225_s2 + $0x150] sm:$0xff] }
  0x1b   :  { %v134_v16 = vld [vmem:[%s2225_s2 + $0x158] sm:$0xff]  ;;  %v148_v18 = vld [vmem:[%s2225_s2 + $0x1c8] sm:$0xff]  ;;  %v147_v19 = vld [vmem:[%s2225_s2 + $0x1c0] sm:$0xff] }
  0x1c   :  { %282 = vperm.xlu1 %1526, %v116_v29   ;;  %277 = vperm.xlu0 %1525, %v115_v30   ;;  %v1558_v20 = vld [vmem:[%s2227_s1 + $0xa8] sm:$0xff]   ;;  %v131_v22 = vld [vmem:[%s2225_s2 + $0x140] sm:$0xff]  ;;  %v146_v23 = vld [vmem:[%s2225_s2 + $0x1b8] sm:$0xff] }
  0x1d   :  { %v132_v21 = vld [vmem:[%s2225_s2 + $0x148] sm:$0xff]  ;;  %v145_v24 = vld [vmem:[%s2225_s2 + $0x1b0] sm:$0xff]  ;;  %v130_v25 = vld [vmem:[%s2225_s2 + $0x138] sm:$0xff] }
  0x1e   :  { %1465 = vmatmul.mubr.msk.bf16.gmra.mxu0 %vm635_vm0, %v1537_v31  ;;  %1509 = vmatmul.mubr.msk.bf16.gmra.mxu1 %vm635_vm0, %v1538_v32  ;;  %v129_v26 = vld [vmem:[%s2225_s2 + $0x130] sm:$0xff]  ;;  %v144_v27 = vld [vmem:[%s2225_s2 + $0x1a8] sm:$0xff]  ;;  %v143_v28 = vld [vmem:[%s2225_s2 + $0x1a0] sm:$0xff] }
  0x1f   :  { %1468 = vmatprep.mubr.msk.bf16.mxu0 %vm635_vm0, %v1539_v33  ;;  %1512 = vmatprep.mubr.msk.bf16.mxu1 %vm635_vm0, %v1540_v34  ;;  %v128_v29 = vld [vmem:[%s2225_s2 + $0x128] sm:$0xff]  ;;  %v127_v30 = vld [vmem:[%s2225_s2 + $0x120] sm:$0xff]  ;;  %v142_v31 = vld [vmem:[%s2225_s2 + $0x198] sm:$0xff] }
  0x20   :  { %202 = vperm.xlu1 %1526, %v100_v35   ;;  %197 = vperm.xlu0 %1525, %v99_v36   ;;  %v141_v32 = vld [vmem:[%s2225_s2 + $0x190] sm:$0xff]  ;;  %v126_v33 = vld [vmem:[%s2225_s2 + $0x118] sm:$0xff]  ;;  %v140_v35 = vld [vmem:[%s2225_s2 + $0x188] sm:$0xff] }
  0x21   :  { %v125_v34 = vld [vmem:[%s2225_s2 + $0x110] sm:$0xff]  ;;  %v139_v36 = vld [vmem:[%s2225_s2 + $0x180] sm:$0xff] }
  0x24   :  { %272 = vperm.xlu1 %1526, %v114_v37   ;;  %267 = vperm.xlu0 %1525, %v113_v38   ;;  %v124_v37 = vld [vmem:[%s2225_s2 + $0x108] sm:$0xff]  ;;  %v123_v38 = vld [vmem:[%s2225_s2 + $0x100] sm:$0xff] }
  0x26   :  { %1469 = vmatmul.mubr.msk.bf16.gmra.mxu0 %vm635_vm0, %v1541_v39  ;;  %1513 = vmatmul.mubr.msk.bf16.gmra.mxu1 %vm635_vm0, %v1542_v40 }
  0x27   :  { %1472 = vmatprep.mubr.msk.bf16.mxu0 %vm635_vm0, %v1543_v41  ;;  %1516 = vmatprep.mubr.msk.bf16.mxu1 %vm635_vm0, %v1544_v42  ;;  %v1186_v41 = vld [vmem:[%s2228_s4 + $0x8] sm:$0xff]  ;;  %v1185_v42 = vld [vmem:[%s2228_s4] sm:$0xff] }
  0x28   :  { %192 = vperm.xlu1 %1526, %v98_v43   ;;  %187 = vperm.xlu0 %1525, %v97_v44  }
  0x2c   :  { %262 = vperm.xlu1 %1526, %v112_v45   ;;  %257 = vperm.xlu0 %1525, %v111_v46  }
  0x2e   :  { %1473 = vmatmul.mubr.msk.bf16.gmra.mxu0 %vm635_vm0, %v1545_v47  ;;  %1517 = vmatmul.mubr.msk.bf16.gmra.mxu1 %vm635_vm0, %v1546_v48 }
  0x2f   :  { %1476 = vmatprep.mubr.msk.bf16.mxu0 %vm635_vm0, %v1547_v49 }
  0x30   :  { %182 = vperm.xlu1 %1526, %v96_v50   ;;  %177 = vperm.xlu0 %1525, %v95_v51  }
  0x34   :  { %252 = vperm.xlu1 %1526, %v110_v52   ;;  %247 = vperm.xlu0 %1525, %v109_v53  }
  0x36   :  { %1477 = vmatmul.mubr.msk.bf16.gmra.mxu0 %vm635_vm0, %v1548_v54 }
  0x37   :  { %1480 = vmatprep.mubr.msk.bf16.mxu0 %vm635_vm0, %v1549_v55 }
  0x38   :  { %172 = vperm.xlu1 %1526, %v94_v56   ;;  %167 = vperm.xlu0 %1525, %v93_v57  }
  0x3c   :  { %242 = vperm.xlu1 %1526, %v108_v58   ;;  %237 = vperm.xlu0 %1525, %v107_v59  }
  0x3e   :  { %1481 = vmatmul.mubr.msk.bf16.gmra.mxu0 %vm635_vm0, %v1550_v60 }
  0x3f   :  { %1484 = vmatprep.mubr.msk.bf16.mxu0 %vm635_vm0, %v1551_v61 }
  0x40   :  { %162 = vperm.xlu1 %1526, %v92_v62   ;;  %157 = vperm.xlu0 %1525, %v91_v63   ;;  %v1561_v62 = vld [vmem:[%s2229_s3 + $0x4] ss:$16 sps:$4 sm:$0xff]  }
  0x41   :  { %1249 = vmatprep.mubr.bf16.mxu1 %v1561_v62 }
  0x44   :  { %472 = vperm.xlu1 %1526, %v154_v0   ;;  %467 = vperm.xlu0 %1525, %v153_v1  }
  0x46   :  { %1485 = vmatmul.mubr.msk.bf16.gmra.mxu0 %vm635_vm0, %v1552_v2 }
  0x47   :  { %1488 = vmatprep.mubr.msk.bf16.mxu0 %vm635_vm0, %v1553_v3 }
  0x48   :  { %392 = vperm.xlu1 %1526, %v138_v4   ;;  %387 = vperm.xlu0 %1525, %v137_v5  }
  0x4c   :  { %462 = vperm.xlu1 %1526, %v152_v6   ;;  %457 = vperm.xlu0 %1525, %v151_v7  }
  0x4e   :  { %1489 = vmatmul.mubr.msk.bf16.gmra.mxu0 %vm635_vm0, %v1554_v8 }
  0x4f   :  { %1492 = vmatprep.mubr.msk.bf16.mxu0 %vm635_vm0, %v1555_v9 }
  0x50   :  { %382 = vperm.xlu1 %1526, %v136_v10   ;;  %377 = vperm.xlu0 %1525, %v135_v11  }
  0x54   :  { %452 = vperm.xlu1 %1526, %v150_v12   ;;  %447 = vperm.xlu0 %1525, %v149_v13  }
  0x56   :  { %1493 = vmatmul.mubr.msk.bf16.gmra.mxu0 %vm635_vm0, %v1556_v14 }
  0x57   :  { %1496 = vmatprep.mubr.msk.bf16.mxu0 %vm635_vm0, %v1557_v15 }
  0x58   :  { %372 = vperm.xlu1 %1526, %v134_v16   ;;  %367 = vperm.xlu0 %1525, %v133_v17  }
  0x5c   :  { %442 = vperm.xlu1 %1526, %v148_v18   ;;  %437 = vperm.xlu0 %1525, %v147_v19  }
  0x5e   :  { %1497 = vmatmul.mubr.msk.bf16.gmra.mxu0 %vm635_vm0, %v1558_v20 }
  0x60   :  { %362 = vperm.xlu1 %1526, %v132_v21   ;;  %357 = vperm.xlu0 %1525, %v131_v22  }
  0x64   :  { %432 = vperm.xlu1 %1526, %v146_v23   ;;  %427 = vperm.xlu0 %1525, %v145_v24  }
  0x68   :  { %352 = vperm.xlu1 %1526, %v130_v25   ;;  %347 = vperm.xlu0 %1525, %v129_v26  }
  0x6c   :  { %422 = vperm.xlu1 %1526, %v144_v27   ;;  %417 = vperm.xlu0 %1525, %v143_v28  }
  0x70   :  { %342 = vperm.xlu1 %1526, %v128_v29   ;;  %337 = vperm.xlu0 %1525, %v127_v30  }
  0x74   :  { %412 = vperm.xlu1 %1526, %v142_v31   ;;  %407 = vperm.xlu0 %1525, %v141_v32  }
  0x78   :  { %332 = vperm.xlu1 %1526, %v126_v33   ;;  %327 = vperm.xlu0 %1525, %v125_v34  }
  0x7c   :  { %402 = vperm.xlu1 %1526, %v140_v35   ;;  %397 = vperm.xlu0 %1525, %v139_v36  }
  0x7d   :  { %v1928_v39 = vpop.permute.xlu0 %307 }
  0x7e   :  { %v1930_v40 = vpop.permute.xlu1 %227 }
  0x80   :  { %322 = vperm.xlu1 %1526, %v124_v37   ;;  %317 = vperm.xlu0 %1525, %v123_v38  }
  0x83   :  { %v1938_v43 = vpop.permute.xlu0 %312  ;;  %v1940_v44 = vpop.permute.xlu1 %232 }
  0x84   :  { %1194 = vperm.xlu1 %1526, %v1186_v41   ;;  %1189 = vperm.xlu0 %1525, %v1185_v42  }
  0x87   :  { %v1942_v45 = vpop.permute.xlu0 %297  ;;  %v1944_v46 = vpop.permute.xlu1 %302 }
  0x8b   :  { %v1946_v47 = vpop.permute.xlu0 %217  ;;  %v1948_v48 = vpop.permute.xlu1 %222 }
  0x8f   :  { %v1950_v49 = vpop.permute.xlu0 %287  ;;  %v1952_v50 = vpop.permute.xlu1 %292 }
  0x93   :  { %v1954_v51 = vpop.permute.xlu0 %207  ;;  %v1956_v52 = vpop.permute.xlu1 %212 }
  0x97   :  { %v1958_v53 = vpop.permute.xlu0 %277  ;;  %v1960_v54 = vpop.permute.xlu1 %282 }
  0x9b   :  { %v1962_v55 = vpop.permute.xlu0 %197  ;;  %v1964_v56 = vpop.permute.xlu1 %202 }
  0x9f   :  { %v1966_v57 = vpop.permute.xlu0 %267  ;;  %v1968_v58 = vpop.permute.xlu1 %272 }
  0xa3   :  { %v188_v59 = vpop.permute.xlu0 %187  ;;  %v193_v60 = vpop.permute.xlu1 %192 }
  0xa7   :  { %v1970_v61 = vpop.permute.xlu0 %257  ;;  %v1975_v63 = vpop.permute.xlu1 %262 }
  0xab   :  { %v178_v0 = vpop.permute.xlu0 %177  ;;  %v183_v1 = vpop.permute.xlu1 %182 }
  0xaf   :  { %v1977_v2 = vpop.permute.xlu0 %247  ;;  %v1979_v3 = vpop.permute.xlu1 %252 }
  0xb3   :  { %v168_v4 = vpop.permute.xlu0 %167  ;;  %v173_v5 = vpop.permute.xlu1 %172 }
  0xb7   :  { %v1981_v6 = vpop.permute.xlu0 %237  ;;  %v1983_v7 = vpop.permute.xlu1 %242 }
  0xbb   :  { %v158_v9 = vpop.permute.xlu0 %157  ;;  %v163_v14 = vpop.permute.xlu1 %162 }
  0xce   :  { %v1458_v8 = vpop.f32.mrf.mxu0  ;;  %v1985_v24 = vpop.f32.mrf.mxu1 }
  0xcf   :  { %v775_v10 = vadd.f32 %v1458_v8, %v168_v4  ;;  %2231 = vst [vmem:[#allocation2_spill] sm:$0xff] %v1985_v24 }
  0xd0   :  { %v766_v11 = vpop.f32.mrf.mxu0  ;;  %v1991_v34 = vpop.f32.mrf.mxu1 }
  0xd1   :  { %v767_v12 = vadd.f32 %v766_v11, %v158_v9  ;;  %v1023_v15 = vmul.f32 0.2, %v775_v10  ;;  %2234 = vst [vmem:[#allocation5_spill] sm:$0xff] %v1991_v34 }
  0xd2   :  { %v1459_v13 = vpop.f32.mrf.mxu0  ;;  %v1995_v4 = vpop.f32.mrf.mxu1 }
  0xd3   :  { %v778_v16 = vadd.f32 %v1459_v13, %v173_v5  ;;  %v1021_v18 = vmul.f32 0.2, %v767_v12  ;;  %v1087_v23 = vmax.f32 %v775_v10, %v1023_v15  ;;  %v2009_v15 = vpop.permute.xlu1 %472 }
  0xd4   :  { %v769_v17 = vpop.f32.mrf.mxu0  ;;  %v2005_v13 = vpop.f32.mrf.mxu1 }
  0xd5   :  { %v770_v19 = vadd.f32 %v769_v17, %v163_v14  ;;  %v1024_v20 = vmul.f32 0.2, %v778_v16  ;;  %v1085_v28 = vmax.f32 %v767_v12, %v1021_v18  ;;  %2236 = vst [vmem:[#allocation7_spill] sm:$0xff] %v2005_v13 }
  0xd6   :  { %v1462_v21 = vpop.f32.mrf.mxu0  ;;  %v2013_v17 = vpop.f32.mrf.mxu1 }
  0xd7   :  { %v1022_v22 = vmul.f32 0.2, %v770_v19  ;;  %v1088_v25 = vmax.f32 %v778_v16, %v1024_v20  ;;  %v791_v26 = vadd.f32 %v1462_v21, %v188_v59  ;;  %v2011_v16 = vpop.permute.xlu0 %467  ;;  %2237 = vst [vmem:[#allocation8_spill] sm:$0xff] %v2013_v17 }
  0xd8   :  { %v782_v27 = vpop.f32.mrf.mxu0  ;;  %v2015_v20 = vpop.f32.mrf.mxu1 }
  0xd9   :  { %v1086_v29 = vmax.f32 %v770_v19, %v1022_v22  ;;  %v783_v30 = vadd.f32 %v782_v27, %v178_v0  ;;  %v1987_v31 = vpack.c.bf16 %v1088_v25, %v1087_v23  ;;  %v1027_v35 = vmul.f32 0.2, %v791_v26  ;;  %2238 = vst [vmem:[#allocation9_spill] sm:$0xff] %v2015_v20  ;;  %v2017_v22 = vpop.permute.xlu1 %392 }
  0xda   :  { %v1463_v32 = vpop.f32.mrf.mxu0 }
  0xdb   :  { %2232 = vst [vmem:[#allocation3_spill] sm:$0xff] %v1987_v31  ;;  %v1989_v33 = vpack.c.bf16 %v1086_v29, %v1085_v28  ;;  %v794_v36 = vadd.f32 %v1463_v32, %v193_v60  ;;  %v1025_v38 = vmul.f32 0.2, %v783_v30  ;;  %v1091_v5 = vmax.f32 %v791_v26, %v1027_v35  ;;  %v2019_v23 = vpop.permute.xlu0 %387  ;;  %v2023_v26 = vpop.f32.mrf.mxu1 }
  0xdc   :  { %v785_v37 = vpop.f32.mrf.mxu0  ;;  %2239 = vst [vmem:[#allocation10_spill] sm:$0xff] %v2023_v26 }
  0xdd   :  { %2233 = vst [vmem:[#allocation4_spill] sm:$0xff] %v1989_v33  ;;  %v786_v41 = vadd.f32 %v785_v37, %v183_v1  ;;  %v1028_v42 = vmul.f32 0.2, %v794_v36  ;;  %v1089_v9 = vmax.f32 %v783_v30, %v1025_v38  ;;  %v2029_v29 = vpop.permute.xlu1 %462  ;;  %v2033_v32 = vpop.f32.mrf.mxu1 }
  0xde   :  { %v1993_v62 = vpop.f32.mrf.mxu0  ;;  %2241 = vst [vmem:[#allocation12_spill] sm:$0xff] %v2033_v32 }
  0xdf   :  { %v1026_v59 = vmul.f32 0.2, %v786_v41  ;;  %v1092_v0 = vmax.f32 %v794_v36, %v1028_v42  ;;  %v2031_v30 = vpop.permute.xlu0 %457  ;;  %v2039_v37 = vpop.f32.mrf.mxu1 }
  0xe0   :  { %v1997_v8 = vpop.f32.mrf.mxu0  ;;  %2240 = vst [vmem:[#allocation11_spill] sm:$0xff] %v2031_v30  ;;  %2242 = vst [vmem:[#allocation13_spill] sm:$0xff] %v2039_v37 }
  0xe1   :  { %v1090_v10 = vmax.f32 %v786_v41, %v1026_v59  ;;  %v1999_v11 = vpack.c.bf16 %v1092_v0, %v1091_v5  ;;  %v2043_v41 = vpop.permute.xlu1 %382  ;;  %v2047_v5 = vpop.f32.mrf.mxu1 }
  0xe2   :  { %v2001_v12 = vpop.f32.mrf.mxu0  ;;  %2243 = vst [vmem:[#allocation14_spill] sm:$0xff] %v2043_v41  ;;  %2245 = vst [vmem:[#allocation16_spill] sm:$0xff] %v2047_v5 }
  0xe3   :  { %v2003_v60 = vpack.c.bf16 %v1090_v10, %v1089_v9  ;;  %v2045_v42 = vpop.permute.xlu0 %377  ;;  %v2055_v32 = vpop.f32.mrf.mxu1 }
  0xe4   :  { %v2007_v1 = vpop.f32.mrf.mxu0  ;;  %2244 = vst [vmem:[#allocation15_spill] sm:$0xff] %v2045_v42  ;;  %2248 = vst [vmem:[#allocation19_spill] sm:$0xff] %v2055_v32 }
  0xe5   :  { %2235 = vst [vmem:[#allocation6_spill] sm:$0xff] %v2003_v60  ;;  %v2051_v10 = vpop.permute.xlu1 %452  ;;  %v2057_v37 = vpop.f32.mrf.mxu1 }
  0xe6   :  { %v1470_v14 = vpop.f32.mrf.mxu0  ;;  %2246 = vst [vmem:[#allocation17_spill] sm:$0xff] %v2051_v10  ;;  %2249 = vst [vmem:[#allocation20_spill] sm:$0xff] %v2057_v37 }
  0xe7   :  { %v2053_v20 = vpop.permute.xlu0 %447  ;;  %v823_v10 = vadd.f32 %v1470_v14, %v1930_v40  ;;  %v2066_v41 = vpop.f32.mrf.mxu1 }
  0xe8   :  { %v814_v18 = vpop.f32.mrf.mxu0  ;;  %2247 = vst [vmem:[#allocation18_spill] sm:$0xff] %v2053_v20  ;;  %2252 = vst [vmem:[#allocation23_spill] sm:$0xff] %v2066_v41 }
  0xe9   :  { %v2059_v31 = vpop.permute.xlu1 %372  ;;  %v1035_v40 = vmul.f32 0.2, %v823_v10  ;;  %v815_v14 = vadd.f32 %v814_v18, %v1946_v47 }
  0xea   :  { %v1471_v19 = vpop.f32.mrf.mxu0  ;;  %2250 = vst [vmem:[#allocation21_spill] sm:$0xff] %v2059_v31 }
  0xeb   :  { %v2061_v34 = vpop.permute.xlu0 %367  ;;  %v826_v5 = vadd.f32 %v1471_v19, %v1940_v44  ;;  %v1033_v24 = vmul.f32 0.2, %v815_v14 }
  0xec   :  { %v817_v21 = vpop.f32.mrf.mxu0  ;;  %2251 = vst [vmem:[#allocation22_spill] sm:$0xff] %v2061_v34 }
  0xed   :  { %v1036_v30 = vmul.f32 0.2, %v826_v5  ;;  %v818_v37 = vadd.f32 %v817_v21, %v1948_v48  ;;  %v2073_v34 = vpop.permute.xlu1 %442 }
  0xee   :  { %v2021_v25 = vpop.f32.mrf.mxu0  ;;  %2253 = vst [vmem:[#allocation24_spill] sm:$0xff] %v2073_v34 }
  0xef   :  { %v2075_v44 = vpop.permute.xlu0 %437  ;;  %v1100_v34 = vmax.f32 %v826_v5, %v1036_v30 }
  0xf0   :  { %v2025_v27 = vpop.f32.mrf.mxu0  ;;  %2254 = vst [vmem:[#allocation25_spill] sm:$0xff] %v2075_v44  ;;  %v1034_v44 = vmul.f32 0.2, %v818_v37 }
  0xf2   :  { %v2027_v28 = vpop.f32.mrf.mxu0 }
  0xf3   :  { %v2097_v30 = vpop.permute.xlu0 %357 }
  0xf4   :  { %v2035_v35 = vpop.f32.mrf.mxu0  ;;  %2258 = vst [vmem:[#allocation29_spill] sm:$0xff] %v2097_v30 }
  0xf6   :  { %v2037_v36 = vpop.f32.mrf.mxu0 }
  0xf8   :  { %v2041_v38 = vpop.f32.mrf.mxu0 }
  0xfa   :  { %v1479_v59 = vpop.f32.mrf.mxu0 }
  0xfc   :  { %v2049_v0 = vpop.f32.mrf.mxu0 }
  0xfe   :  { %v1482_v9 = vpop.f32.mrf.mxu0 }
 0x100   :  { %v862_v17 = vpop.f32.mrf.mxu0 }
 0x101   :  { %v863_v5 = vadd.f32 %v862_v17, %v1958_v53  ;;  %v799_v53 = vadd.f32 %v1997_v8, %v1962_v55  ;;  %v1097_v17 = vmax.f32 %v815_v14, %v1033_v24  ;;  %v2118_v55 = vpop.permute.xlu0 %427  ;;  %v850_v8 = vadd.f32 %v2049_v0, %v1975_v63 }
 0x102   :  { %v1483_v26 = vpop.f32.mrf.mxu0 }
 0x103   :  { %v2071_v60 = vadd.f32 %v1483_v26, %v1952_v50  ;;  %v810_v26 = vadd.f32 %v2001_v12, %v1956_v52  ;;  %v2095_v12 = vpop.permute.xlu1 %362  ;;  %v1042_v0 = vmul.f32 0.2, %v850_v8 }
 0x104   :  { %v865_v33 = vpop.f32.mrf.mxu0 }
 0x105   :  { %v1048_v41 = vmul.f32 0.2, %v2071_v60  ;;  %v866_v47 = vadd.f32 %v865_v33, %v1960_v54 }
 0x106   :  { %v1486_v42 = vpop.f32.mrf.mxu0 }
 0x107   :  { %v887_v13 = vadd.f32 %v1486_v42, %v1928_v39  ;;  %v2079_v42 = vpop.f32.mrf.mxu1 }
 0x108   :  { %v878_v20 = vpop.f32.mrf.mxu0  ;;  %2255 = vst [vmem:[#allocation26_spill] sm:$0xff] %v2079_v42 }
 0x109   :  { %v879_v32 = vadd.f32 %v878_v20, %v1942_v45  ;;  %v1051_v19 = vmul.f32 0.2, %v887_v13  ;;  %v871_v45 = vadd.f32 %v1482_v9, %v1950_v49  ;;  %v807_v49 = vadd.f32 %v1993_v62, %v1954_v51 }
 0x10a   :  { %v1487_v31 = vpop.f32.mrf.mxu0  ;;  %v1099_v9 = vmax.f32 %v823_v10, %v1035_v40  ;;  %v802_v51 = vadd.f32 %v2007_v1, %v1964_v56  ;;  %v1098_v10 = vmax.f32 %v818_v37, %v1034_v44  ;;  %v858_v40 = vadd.f32 %v1479_v59, %v1968_v58  ;;  %v2116_v59 = vpop.permute.xlu1 %432 }
 0x10b   :  { %v890_v39 = vadd.f32 %v1487_v31, %v1938_v43  ;;  %v1049_v48 = vmul.f32 0.2, %v879_v32  ;;  %v1115_v31 = vmax.f32 %v887_v13, %v1051_v19  ;;  %v1032_v19 = vmul.f32 0.2, %v810_v26 }
 0x10c   :  { %v881_v20 = vpop.f32.mrf.mxu0  ;;  %v1160_v62 = vpack.c.bf16 %v1100_v34, %v1099_v9  ;;  %v1031_v30 = vmul.f32 0.2, %v807_v49  ;;  %v855_v56 = vadd.f32 %v2037_v36, %v1966_v57  ;;  %v1045_v58 = vmul.f32 0.2, %v863_v5 }
 0x10d   :  { %v1052_v21 = vmul.f32 0.2, %v890_v39  ;;  %v882_v50 = vadd.f32 %v881_v20, %v1944_v46  ;;  %v2091_v46 = vpop.f32.mrf.mxu1  ;;  %v1047_v20 = vmul.f32 0.2, %v871_v45  ;;  %v1113_v54 = vmax.f32 %v879_v32, %v1049_v48 }
 0x10e   :  { %v2086_v43 = vpop.f32.mrf.mxu0  ;;  %v1030_v1 = vmul.f32 0.2, %v802_v51  ;;  %v1159_v37 = vpack.c.bf16 %v1098_v10, %v1097_v17  ;;  %v1044_v24 = vmul.f32 0.2, %v858_v40  ;;  %v1095_v48 = vmax.f32 %v807_v49, %v1031_v30  ;;  %v2130_v30 = vpop.permute.xlu1 %352 }
 0x10f   :  { %2256 = vst [vmem:[#allocation27_spill] sm:$0xff] %v2086_v43  ;;  %v1116_v18 = vmax.f32 %v890_v39, %v1052_v21  ;;  %v1050_v42 = vmul.f32 0.2, %v882_v50  ;;  %v1112_v21 = vmax.f32 %v2071_v60, %v1048_v41  ;;  %v2108_v32 = vpop.f32.mrf.mxu1  ;;  %v1111_v34 = vmax.f32 %v871_v45, %v1047_v20 }
 0x110   :  { %v2093_v52 = vpop.f32.mrf.mxu0  ;;  %v1096_v60 = vmax.f32 %v810_v26, %v1032_v19  ;;  %v1029_v57 = vmul.f32 0.2, %v799_v53  ;;  %v847_v26 = vadd.f32 %v2041_v38, %v1970_v61  ;;  %v842_v9 = vadd.f32 %v2027_v28, %v1979_v3 }
 0x111   :  { %2257 = vst [vmem:[#allocation28_spill] sm:$0xff] %v2093_v52  ;;  %v1114_v33 = vmax.f32 %v882_v50, %v1050_v42  ;;  %v1168_v13 = vpack.c.bf16 %v1116_v18, %v1115_v31  ;;  %v1046_v52 = vmul.f32 0.2, %v866_v47  ;;  %v1166_v14 = vpack.c.bf16 %v1112_v21, %v1111_v34  ;;  %v1518_v36 = vpop.f32.mrf.mxu1 }
 0x112   :  { %v2102_v39 = vpop.f32.mrf.mxu0  ;;  %v1043_v50 = vmul.f32 0.2, %v855_v56  ;;  %v1158_v31 = vpack.c.bf16 %v1096_v60, %v1095_v48  ;;  %v1094_v18 = vmax.f32 %v802_v51, %v1030_v1  ;;  %v1108_v63 = vmax.f32 %v858_v40, %v1044_v24  ;;  %v2142_v40 = vpop.permute.xlu1 %422  ;;  %v2260_v48 = vld [vmem:[#allocation6_spill] sm:$0xff] }
 0x113   :  { %1408 = vmatprep.subr.bf16.mxu1 %v1168_v13  ;;  %v1167_v43 = vpack.c.bf16 %v1114_v33, %v1113_v54  ;;  %v1110_v44 = vmax.f32 %v866_v47, %v1046_v52  ;;  %v1093_v20 = vmax.f32 %v799_v53, %v1029_v57  ;;  %v1006_v52 = vpop.f32.mrf.mxu1  ;;  %v839_v61 = vadd.f32 %v2021_v25, %v1977_v2  ;;  %v2134_v54 = vpop.permute.xlu0 %347 }
 0x114   :  { %v2110_v42 = vpop.f32.mrf.mxu0  ;;  %1409 = vmatpush3.bf16.msra.mxu1 %v1160_v62  ;;  %v1107_v38 = vmax.f32 %v855_v56, %v1043_v50  ;;  %v1040_v3 = vmul.f32 0.2, %v842_v9  ;;  %v834_v28 = vadd.f32 %v2035_v35, %v1983_v7  ;;  %v1106_v13 = vmax.f32 %v850_v8, %v1042_v0 }
 0x115   :  { %1410 = vmatprep.subr.bf16.mxu1 %v1167_v43  ;;  %v1109_v43 = vmax.f32 %v863_v5, %v1045_v58  ;;  %v1041_v5 = vmul.f32 0.2, %v847_v26  ;;  %v1157_v33 = vpack.c.bf16 %v1094_v18, %v1093_v20  ;;  %v1519_v62 = vpop.f32.mrf.mxu1  ;;  %v1039_v10 = vmul.f32 0.2, %v839_v61  ;;  %v2265_v20 = vld [vmem:[#allocation15_spill] sm:$0xff] }
 0x116   :  { %v2114_v41 = vpop.f32.mrf.mxu0  ;;  %v1164_v51 = vpack.c.bf16 %v1108_v63, %v1107_v38  ;;  %v831_v2 = vadd.f32 %v2025_v27, %v1981_v6  ;;  %v1104_v21 = vmax.f32 %v842_v9, %v1040_v3  ;;  %v1018_v53 = vadd.f32 %v1519_v62, %v2009_v15 }
 0x117   :  { %v1165_v49 = vpack.c.bf16 %v1110_v44, %v1109_v43  ;;  %v1105_v25 = vmax.f32 %v847_v26, %v1041_v5  ;;  %v1038_v17 = vmul.f32 0.2, %v834_v28  ;;  %v2145_v35 = vpop.permute.xlu0 %417  ;;  %v1009_v34 = vpop.f32.mrf.mxu1  ;;  %v1103_v58 = vmax.f32 %v839_v61, %v1039_v10  ;;  %v2259_v44 = vld [vmem:[#allocation2_spill] sm:$0xff]  ;;  %v2266_v61 = vld [vmem:[#allocation5_spill] sm:$0xff]  ;;  %v2267_v5 = vld [vmem:[#allocation3_spill] sm:$0xff] }
 0x118   :  { %v2122_v45 = vpop.f32.mrf.mxu0  ;;  %1411 = vmatpush3.bf16.msra.mxu1 %v1159_v37  ;;  %v1015_v60 = vadd.f32 %v1518_v36, %v2011_v16  ;;  %v1037_v1 = vmul.f32 0.2, %v831_v2  ;;  %v954_v6 = vadd.f32 %v1995_v4, %v2017_v22  ;;  %v1084_v27 = vmul.f32 0.2, %v1018_v53  ;;  %v2261_v36 = vld [vmem:[#allocation11_spill] sm:$0xff]  ;;  %v2262_v4 = vld [vmem:[#allocation14_spill] sm:$0xff] }
 0x119   :  { %1412 = vmatprep.subr.bf16.mxu1 %v1166_v14  ;;  %v1163_v7 = vpack.c.bf16 %v1106_v13, %v1105_v25  ;;  %v1102_v37 = vmax.f32 %v834_v28, %v1038_v17  ;;  %v1010_v15 = vadd.f32 %v1009_v34, %v2029_v29  ;;  %v1162_v8 = vpack.c.bf16 %v1104_v21, %v1103_v58  ;;  %v2263_v22 = vld [vmem:[#allocation7_spill] sm:$0xff]  ;;  %v2264_v29 = vld [vmem:[#allocation17_spill] sm:$0xff]  ;;  %v2271_v25 = vld [vmem:[#allocation24_spill] sm:$0xff] }
 0x11a   :  { %v2128_v47 = vpop.f32.mrf.mxu0  ;;  %v951_v14 = vadd.f32 %v2259_v44, %v2019_v23  ;;  %v1083_v57 = vmul.f32 0.2, %v1015_v60  ;;  %v1101_v16 = vmax.f32 %v831_v2, %v1037_v1  ;;  %v1007_v50 = vadd.f32 %v1006_v52, %v2261_v36  ;;  %v2268_v52 = vld [vmem:[#allocation18_spill] sm:$0xff]  ;;  %v2270_v10 = vld [vmem:[#allocation21_spill] sm:$0xff] }
 0x11b   :  { %v1068_v26 = vmul.f32 0.2, %v954_v6  ;;  %v946_v43 = vadd.f32 %v2263_v22, %v2262_v4  ;;  %v1002_v18 = vadd.f32 %v2091_v46, %v2264_v29  ;;  %v1148_v9 = vmax.f32 %v1018_v53, %v1084_v27  ;;  %v1559_v58 = vld [vmem:[%s2229_s3] ss:$16 sps:$4 sm:$0xff]   ;;  %v2277_v29 = vld [vmem:[#allocation13_spill] sm:$0xff] }
 0x11c   :  { %1413 = vmatpush3.bf16.msra.mxu1 %v1158_v31  ;;  %v2138_v19 = vpop.f32.mrf.mxu0  ;;  %v2160_v31 = vpop.permute.xlu0 %337  ;;  %v1082_v23 = vmul.f32 0.2, %v1010_v15  ;;  %v1161_v0 = vpack.c.bf16 %v1102_v37, %v1101_v16  ;;  %v943_v38 = vadd.f32 %v2266_v61, %v2265_v20  ;;  %v1147_v28 = vmax.f32 %v1015_v60, %v1083_v57  ;;  %v2275_v57 = vld [vmem:[#allocation25_spill] sm:$0xff]  ;;  %v2276_v16 = vld [vmem:[#allocation26_spill] sm:$0xff] }
 0x11d   :  { %1414 = vmatprep.subr.bf16.mxu1 %v1165_v49  ;;  %v1067_v49 = vmul.f32 0.2, %v951_v14  ;;  %v1081_v13 = vmul.f32 0.2, %v1007_v50  ;;  %v1066_v62 = vmul.f32 0.2, %v946_v43  ;;  %v2172_v21 = vadd.f32 %v2108_v32, %v2271_v25 }
 0x11e   :  { %v1498_v56 = vpop.f32.mrf.mxu0  ;;  %v1080_v2 = vmul.f32 0.2, %v1002_v18  ;;  %v1146_v17 = vmax.f32 %v1010_v15, %v1082_v23  ;;  %v1184_v34 = vpack.c.bf16 %v1148_v9, %v1147_v28  ;;  %v1065_v1 = vmul.f32 0.2, %v943_v38  ;;  %v1564_v32 = vld [vmem:[%s2229_s3 + $0xc] ss:$16 sps:$4 sm:$0xff]  }
 0x11f   :  { %v1131_v60 = vmax.f32 %v951_v14, %v1067_v49  ;;  %v991_v36 = vadd.f32 %v2276_v16, %v2275_v57  ;;  %v1130_v4 = vmax.f32 %v946_v43, %v1066_v62  ;;  %v1078_v23 = vmul.f32 0.2, %v2172_v21  ;;  %v2278_v61 = vld [vmem:[#allocation29_spill] sm:$0xff] }
 0x120   :  { %1415 = vmatpush3.bf16.msra.mxu1 %v1157_v33  ;;  %v926_v24 = vpop.f32.mrf.mxu0  ;;  %v2269_v33 = vld [vmem:[#allocation23_spill] sm:$0xff]  ;;  %v408_v37 = vpop.permute.xlu0 %407  ;;  %v1144_v9 = vmax.f32 %v1002_v18, %v1080_v2 }
 0x121   :  { %1416 = vmatprep.subr.bf16.mxu1 %v1164_v51  ;;  %v999_v3 = vadd.f32 %v2269_v33, %v2268_v52  ;;  %v1132_v51 = vmax.f32 %v954_v6, %v1068_v26  ;;  %v2272_v6 = vld [vmem:[#allocation19_spill] sm:$0xff]  ;;  %v1145_v26 = vmax.f32 %v1007_v50, %v1081_v13  ;;  %v927_v50 = vadd.f32 %v926_v24, %v2278_v61  ;;  %v2280_v52 = vld [vmem:[#allocation16_spill] sm:$0xff] }
 0x122   :  { %v1499_v63 = vpop.f32.mrf.mxu0  ;;  %v2179_v27 = vadd.f32 %v2272_v6, %v2116_v59  ;;  %v1077_v18 = vmul.f32 0.2, %v991_v36  ;;  %v2282_v6 = vld [vmem:[#allocation8_spill] sm:$0xff] }
 0x123   :  { %v938_v46 = vadd.f32 %v1499_v63, %v2270_v10  ;;  %v1079_v15 = vmul.f32 0.2, %v999_v3  ;;  %v1176_v14 = vpack.c.bf16 %v1132_v51, %v1131_v60  ;;  %v1183_v63 = vpack.c.bf16 %v1146_v17, %v1145_v26  ;;  %v2281_v60 = vld [vmem:[#allocation10_spill] sm:$0xff] }
 0x124   :  { %1417 = vmatpush3.bf16.msra.mxu1 %v1999_v11  ;;  %v2155_v11 = vpop.permute.xlu1 %342  ;;  %v1076_v49 = vmul.f32 0.2, %v2179_v27  ;;  %v328_v13 = vpop.permute.xlu0 %327  ;;  %v1142_v10 = vmax.f32 %v2172_v21, %v1078_v23  ;;  %v1061_v25 = vmul.f32 0.2, %v927_v50 }
 0x125   :  { %1418 = vmatprep.subr.bf16.mxu1 %v1163_v7  ;;  %v929_v7 = vpop.f32.mrf.mxu0  ;;  %v1064_v22 = vmul.f32 0.2, %v938_v46  ;;  %v1143_v43 = vmax.f32 %v999_v3, %v1079_v15 }
 0x126   :  { %v930_v59 = vadd.f32 %v929_v7, %v2095_v12 }
 0x127   :  { %v1128_v51 = vmax.f32 %v938_v46, %v1064_v22  ;;  %v1182_v3 = vpack.c.bf16 %v1144_v9, %v1143_v43  ;;  %v2284_v22 = vld [vmem:[#allocation9_spill] sm:$0xff] }
 0x128   :  { %1419 = vmatpush3.bf16.msra.mxu1 %v2260_v48  ;;  %v413_v53 = vpop.permute.xlu1 %412  ;;  %v2274_v48 = vld [vmem:[#allocation4_spill] sm:$0xff]  ;;  %v1062_v62 = vmul.f32 0.2, %v930_v59 }
 0x129   :  { %1420 = vmatprep.subr.bf16.mxu1 %v1162_v8  ;;  %v2273_v8 = vld [vmem:[#allocation22_spill] sm:$0xff] }
 0x12a   :  { %v935_v44 = vadd.f32 %v1498_v56, %v2273_v8  ;;  %v983_v56 = vadd.f32 %v2277_v29, %v2118_v55  ;;  %v975_v55 = vadd.f32 %v2280_v52, %v2145_v35  ;;  %v1140_v35 = vmax.f32 %v2179_v27, %v1076_v49  ;;  %v2285_v29 = vld [vmem:[#allocation27_spill] sm:$0xff]  ;;  %v2286_v52 = vld [vmem:[#allocation28_spill] sm:$0xff] }
 0x12b   :  { %v1126_v46 = vmax.f32 %v930_v59, %v1062_v62  ;;  %v911_v27 = vadd.f32 %v2122_v45, %v2160_v31 }
 0x12c   :  { %1421 = vmatpush3.bf16.msra.mxu1 %v2267_v5  ;;  %v1063_v20 = vmul.f32 0.2, %v935_v44  ;;  %v2279_v5 = vld [vmem:[#allocation20_spill] sm:$0xff]  ;;  %v333_v33 = vpop.permute.xlu1 %332  ;;  %v1075_v24 = vmul.f32 0.2, %v983_v56 }
 0x12d   :  { %1422 = vmatprep.subr.bf16.mxu1 %v1161_v0  ;;  %v1129_v0 = vmax.f32 %v943_v38, %v1065_v1  ;;  %v978_v12 = vadd.f32 %v2279_v5, %v2142_v40  ;;  %v922_v38 = vadd.f32 %v2128_v47, %v2130_v30  ;;  %v919_v40 = vadd.f32 %v2114_v41, %v2134_v54 }
 0x12e   :  { %v1127_v2 = vmax.f32 %v935_v44, %v1063_v20  ;;  %v1073_v7 = vmul.f32 0.2, %v975_v55  ;;  %v914_v47 = vadd.f32 %v2138_v19, %v2155_v11  ;;  %v1139_v21 = vmax.f32 %v983_v56, %v1075_v24  ;;  %v398_v44 = vpop.permute.xlu0 %397 }
 0x12f   :  { %v1175_v28 = vpack.c.bf16 %v1130_v4, %v1129_v0  ;;  %v1074_v17 = vmul.f32 0.2, %v978_v12  ;;  %v970_v1 = vadd.f32 %v2281_v60, %v413_v53  ;;  %v967_v41 = vadd.f32 %v2282_v6, %v408_v37 }
 0x130   :  { %1423 = vmatpush3.bf16.msra.mxu1 %v2274_v48  ;;  %v1174_v30 = vpack.c.bf16 %v1128_v51, %v1127_v2  ;;  %v403_v54 = vpop.permute.xlu1 %402  ;;  %v1059_v48 = vmul.f32 0.2, %v919_v40  ;;  %v1137_v57 = vmax.f32 %v975_v55, %v1073_v7  ;;  %v1180_v19 = vpack.c.bf16 %v1140_v35, %v1139_v21  ;;  %v1562_v35 = vld [vmem:[%s2229_s3 + $0x8] ss:$16 sps:$4 sm:$0xff]  }
 0x131   :  { %1430 = vmatprep.subr.bf16.mxu1 %v1184_v34  ;;  %v1141_v34 = vmax.f32 %v991_v36, %v1077_v18  ;;  %v1138_v15 = vmax.f32 %v978_v12, %v1074_v17  ;;  %v906_v11 = vadd.f32 %v2102_v39, %v333_v33  ;;  %v1058_v36 = vmul.f32 0.2, %v914_v47 }
 0x132   :  { %v1072_v26 = vmul.f32 0.2, %v970_v1  ;;  %v1071_v37 = vmul.f32 0.2, %v967_v41  ;;  %v959_v59 = vadd.f32 %v2284_v22, %v398_v44  ;;  %v903_v56 = vadd.f32 %v2285_v29, %v328_v13  ;;  %v318_v5 = vpop.permute.xlu0 %317 }
 0x133   :  { %1250 = vmatmul.mubr.bf16.vlgmr.msra.gmra.mxu1 %v1559_v58  ;;  %v1060_v58 = vmul.f32 0.2, %v922_v38  ;;  %v1181_v8 = vpack.c.bf16 %v1142_v10, %v1141_v34  ;;  %v1123_v45 = vmax.f32 %v919_v40, %v1059_v48  ;;  %v1057_v31 = vmul.f32 0.2, %v911_v27 }
 0x134   :  { %1431 = vmatpush3.bf16.msra.mxu1 %v1176_v14  ;;  %1290 = vmatprep.mubr.bf16.mxu1 %v1564_v32  ;;  %v1125_v32 = vmax.f32 %v927_v50, %v1061_v25  ;;  %v2283_v14 = vld [vmem:[#allocation12_spill] sm:$0xff]  ;;  %v323_v9 = vpop.permute.xlu1 %322  ;;  %v1179_v23 = vpack.c.bf16 %v1138_v15, %v1137_v57  ;;  %v1122_v49 = vmax.f32 %v914_v47, %v1058_v36  ;;  %v1069_v43 = vmul.f32 0.2, %v959_v59 }
 0x135   :  { %1432 = vmatprep.subr.bf16.mxu1 %v1183_v63  ;;  %v1124_v16 = vmax.f32 %v922_v38, %v1060_v58  ;;  %v962_v4 = vadd.f32 %v2283_v14, %v403_v54  ;;  %v1056_v63 = vmul.f32 0.2, %v906_v11  ;;  %v898_v39 = vadd.f32 %v2110_v42, %v323_v9 }
 0x136   :  { %v1173_v53 = vpack.c.bf16 %v1126_v46, %v1125_v32  ;;  %v1136_v20 = vmax.f32 %v970_v1, %v1072_v26  ;;  %v1135_v61 = vmax.f32 %v967_v41, %v1071_v37  ;;  %v1055_v12 = vmul.f32 0.2, %v903_v56  ;;  %v1190_v46 = vpop.permute.xlu0 %1189 }
 0x137   :  { %v1172_v0 = vpack.c.bf16 %v1124_v16, %v1123_v45  ;;  %v1070_v50 = vmul.f32 0.2, %v962_v4  ;;  %v895_v55 = vadd.f32 %v2286_v52, %v318_v5  ;;  %v1121_v18 = vmax.f32 %v911_v27, %v1057_v31 }
 0x138   :  { %1433 = vmatpush3.bf16.msra.mxu1 %v1175_v28  ;;  %v1120_v33 = vmax.f32 %v906_v11, %v1056_v63  ;;  %v1054_v28 = vmul.f32 0.2, %v898_v39  ;;  %v1133_v51 = vmax.f32 %v959_v59, %v1069_v43  ;;  %v1178_v62 = vpack.c.bf16 %v1136_v20, %v1135_v61 }
 0x139   :  { %1434 = vmatprep.subr.bf16.mxu1 %v1182_v3  ;;  %v1171_v13 = vpack.c.bf16 %v1122_v49, %v1121_v18  ;;  %v1134_v38 = vmax.f32 %v962_v4, %v1070_v50  ;;  %v1119_v42 = vmax.f32 %v903_v56, %v1055_v12  ;;  %v1053_v24 = vmul.f32 0.2, %v895_v55 }
 0x13a   :  { %v1118_v3 = vmax.f32 %v898_v39, %v1054_v28 }
 0x13b   :  { %v1170_v10 = vpack.c.bf16 %v1120_v33, %v1119_v42  ;;  %v1177_v40 = vpack.c.bf16 %v1134_v38, %v1133_v51  ;;  %v1117_v2 = vmax.f32 %v895_v55, %v1053_v24 }
 0x13c   :  { %1435 = vmatpush3.bf16.msra.mxu1 %v1174_v30 }
 0x13d   :  { %1436 = vmatprep.subr.bf16.mxu1 %v1181_v8  ;;  %v1169_v25 = vpack.c.bf16 %v1118_v3, %v1117_v2  ;;  %v1195_v8 = vpop.permute.xlu1 %1194 }
 0x140   :  { %1437 = vmatpush3.bf16.msra.mxu1 %v1173_v53 }
 0x141   :  { %1438 = vmatprep.subr.bf16.mxu1 %v1180_v19 }
 0x144   :  { %1439 = vmatpush3.bf16.msra.mxu1 %v1172_v0 }
 0x145   :  { %1440 = vmatprep.subr.bf16.mxu1 %v1179_v23 }
 0x148   :  { %1441 = vmatpush3.bf16.msra.mxu1 %v1171_v13 }
 0x149   :  { %1442 = vmatprep.subr.bf16.mxu1 %v1178_v62 }
 0x14c   :  { %1443 = vmatpush3.bf16.msra.mxu1 %v1170_v10 }
 0x14d   :  { %1444 = vmatprep.subr.bf16.mxu1 %v1177_v40 }
 0x150   :  { %1445 = vmatpush3.bf16.msra.mxu1 %v1169_v25 }
 0x153   :  { %1291 = vmatmul.mubr.bf16.vlgmr.msra.gmra.mxu1 %v1562_v35 }
 0x1f3   :  { %v1424_v17 = vpop.f32.mrf.mxu1 }
 0x1f5   :  { %v1425_v7 = vpop.f32.mrf.mxu1 }
 0x1f6   :  { %v1426_v47 = vadd.f32 %v1425_v7, %v1424_v17 }
 0x1f7   :  { %v1427_v34 = vpop.f32.mrf.mxu1 }
 0x1f8   :  { %v1252_v60 = vadd.f32 %v1426_v47, %v1190_v46 }
 0x1f9   :  { %v1428_v58 = vpop.f32.mrf.mxu1 }
 0x1fa   :  { %v1429_v1 = vadd.f32 %v1428_v58, %v1427_v34 }
 0x1fc   :  { %v1255_v48 = vadd.f32 %v1429_v1, %v1195_v8 }
 0x213   :  { %v1446_v30 = vpop.f32.mrf.mxu1 }
 0x215   :  { %v1447_v21 = vpop.f32.mrf.mxu1 }
 0x216   :  { %v1448_v6 = vadd.f32 %v1447_v21, %v1446_v30 }
 0x217   :  { %v1449_v41 = vpop.f32.mrf.mxu1 }
 0x218   :  { %v1293_v54 = vadd.f32 %v1448_v6, %v1252_v60 }
 0x219   :  { %v1450_v44 = vpop.f32.mrf.mxu1 }
 0x21a   :  { %1300 = vst.msk [vmem:[%s2230_s5] sm:$0xff] %vm1299_vm1, %v1293_v54  ;;  %v1451_v27 = vadd.f32 %v1450_v44, %v1449_v41 }
 0x21c   :  { %v1296_v32 = vadd.f32 %v1451_v27, %v1255_v48 }
 0x21e   :  { %1301 = vst.msk [vmem:[%s2230_s5 + $0x8] sm:$0xff] %vm1299_vm1, %v1296_v32 }

</bundles_post_ra>
